<compile_context>
chip_gen: v7x
topology: tpu7x:2x2x1
jax: 0.10.0
libtpu: 0.0.40
codegen_flags: <defaults>
</compile_context>

<pallas_src>
import jax
import jax.numpy as jnp
from jax.experimental import pallas as pl
from jax.experimental.pallas import tpu as pltpu


def _round_up(v, m):
    return ((v + m - 1) // m) * m


def _pick_tile_m(n):
    # MXU-sized row tiles; ensure >=2 grid steps when the batch allows it so a
    # "parallel" M axis can actually be sharded across both v7x TensorCores.
    if n >= 2048:
        return 512
    if n >= 512:
        return 256
    if n >= 256:
        return 128
    return _round_up(max(n, 1), 16)   # tiny batch: one 16-row (bf16-packed) tile


def _vmem_limit_bytes(estimate):
    # Derive the cap from the actual part (64 MiB v7x vs 128 MiB v5e/v6e),
    # leaving headroom for compiler-internal scratch.
    try:
        cap = int(pltpu.get_tpu_info().vmem_capacity_bytes)
    except Exception:
        cap = 64 * 1024 * 1024
    return int(min(max(2 * estimate, 8 * 1024 * 1024), int(0.72 * cap)))


def _resident_spec(shape):
    # Constant-index (resident) block: request single buffering if available.
    try:
        return pl.BlockSpec(shape, lambda i: (0,) * len(shape),
                            pipeline_mode=pl.Buffered(1))
    except Exception:
        return pl.BlockSpec(shape, lambda i: (0,) * len(shape))


def _two_layer_kernel(x_ref, w1_ref, b1_ref, w2_ref, b2_ref, o_ref):
    # x_ref :(TILE_M,Kp) f32    w1_ref:(Kp,Hp) bf16   b1_ref:(1,Hp) f32
    # w2_ref:(Hp,Op)    bf16    b2_ref:(1,Op)  f32    o_ref:(TILE_M,Op) f32
    x = x_ref[...].astype(jnp.bfloat16)          # cast in-kernel (no HBM pre-pass)
    # Layer 1: plain [M,K]x[K,N] on pre-transposed W1, f32 accumulation.
    h = jnp.dot(x, w1_ref[...], preferred_element_type=jnp.float32)
    h = jnp.maximum(h + b1_ref[...], 0.0)        # bias + ReLU (clamp(min=0)) in f32
    # Layer 2: bf16 MXU inputs, f32 accumulate.
    y = jnp.dot(h.astype(jnp.bfloat16), w2_ref[...],
                preferred_element_type=jnp.float32)
    o_ref[...] = (y + b2_ref[...]).astype(o_ref.dtype)


@jax.jit
def two_layer_net(x, w1, b1, w2, b2):
    """x:(N,D_in)  w1:(H,D_in)  b1:(H,)  w2:(D_out,H)  b2:(D_out,)  -> (N,D_out) f32."""
    N, D_in = x.shape
    H = w1.shape[0]
    D_out = w2.shape[0]

    # Lane-dense (128-aligned) feature dims; zero padding keeps the math exact.
    Kp = _round_up(D_in, 128)
    Hp = _round_up(H, 128)
    Op = _round_up(D_out, 128)

    TILE_M = _pick_tile_m(N)
    Np = _round_up(N, TILE_M)
    grid = (Np // TILE_M,)

    # x stays f32 in HBM; pad only if the static shapes require it.
    x_f32 = x.astype(jnp.float32)
    x_p = x_f32 if (Np, Kp) == (N, D_in) else jnp.pad(
        x_f32, ((0, Np - N), (0, Kp - D_in)))

    # One-time wrapper-side transpose of the small weight matrices -> plain
    # [M,K]x[K,N] contractions in the kernel. bf16 halves weight DMA.
    w1_t = jnp.pad(w1.T, ((0, Kp - D_in), (0, Hp - H))).astype(jnp.bfloat16)   # (Kp,Hp)
    w2_t = jnp.pad(w2.T, ((0, Hp - H), (0, Op - D_out))).astype(jnp.bfloat16)  # (Hp,Op)
    b1_p = jnp.pad(b1, (0, Hp - H)).reshape(1, Hp).astype(jnp.float32)
    b2_p = jnp.pad(b2, (0, Op - D_out)).reshape(1, Op).astype(jnp.float32)

    # VMEM estimate: double-buffered x/out tiles (f32), single-buffered bf16
    # weights, f32 biases, f32 hidden tile + bf16 temporaries.
    est = (2 * TILE_M * Kp * 4 + 2 * TILE_M * Op * 4
           + Kp * Hp * 2 + Hp * Op * 2
           + 8 * Hp * 4 + 8 * Op * 4
           + TILE_M * Hp * 4 + TILE_M * (Kp + Hp) * 2)
    vmem_limit = _vmem_limit_bytes(est)

    flops = 2 * Np * Kp * Hp + 2 * Np * Hp * Op
    bytes_accessed = (Np * Kp * 4 + Kp * Hp * 2 + Hp * Op * 2
                      + Hp * 4 + Op * 4 + Np * Op * 4)

    out = pl.pallas_call(
        _two_layer_kernel,
        out_shape=jax.ShapeDtypeStruct((Np, Op), jnp.float32),
        grid=grid,
        in_specs=[
            pl.BlockSpec((TILE_M, Kp), lambda i: (i, 0)),   # streamed x tile
            _resident_spec((Kp, Hp)),                       # resident W1.T (single-buffered)
            _resident_spec((1, Hp)),                        # resident b1
            _resident_spec((Hp, Op)),                       # resident W2.T (single-buffered)
            _resident_spec((1, Op)),                        # resident b2
        ],
        out_specs=pl.BlockSpec((TILE_M, Op), lambda i: (i, 0)),
        compiler_params=pltpu.CompilerParams(
            dimension_semantics=("parallel",),              # shard M across TCs on v7x
            vmem_limit_bytes=vmem_limit),
        cost_estimate=pl.CostEstimate(
            flops=flops, transcendentals=0, bytes_accessed=bytes_accessed),
    )(x_p, w1_t, b1_p, w2_t, b2_p)

    # Strip padding back to the logical (N, D_out).
    return out[:N, :D_out]


def _init_linear(key, out_features, in_features):
    # Deterministic init mimicking torch.nn.Linear default:
    # U(-1/sqrt(fan_in), 1/sqrt(fan_in)) for both weight and bias.
    kw, kb = jax.random.split(key)
    bound = 1.0 / jnp.sqrt(jnp.float32(in_features))
    w = jax.random.uniform(kw, (out_features, in_features), jnp.float32,
                           minval=-bound, maxval=bound)
    b = jax.random.uniform(kb, (out_features,), jnp.float32,
                           minval=-bound, maxval=bound)
    return w, b


if __name__ == "__main__":
    # Small shapes consistent with the module: N x D_in input, hidden H, output D_out.
    N, D_in, H, D_out = 8, 32, 64, 16

    key = jax.random.PRNGKey(0)
    kx, k1, k2 = jax.random.split(key, 3)

    x = jax.random.normal(kx, (N, D_in), dtype=jnp.float32)
    w1, b1 = _init_linear(k1, H, D_in)       # linear1: D_in -> H
    w2, b2 = _init_linear(k2, D_out, H)      # linear2: H -> D_out

    y = two_layer_net(x, w1, b1, w2, b2)
    jax.block_until_ready(y)
    assert y.shape == (N, D_out)

    # f32 reference (exact PyTorch forward math) — loose tol for bf16 MXU inputs.
    y_f32 = jnp.maximum(x @ w1.T + b1, 0.0) @ w2.T + b2
    assert jnp.allclose(y, y_f32, atol=5e-2, rtol=5e-2)

    # bf16-input / f32-accumulate emulation of the kernel — tight tolerance.
    rt = lambda a: a.astype(jnp.bfloat16).astype(jnp.float32)
    h_emu = jnp.maximum(rt(x) @ rt(w1).T + b1, 0.0)
    y_emu = rt(h_emu) @ rt(w2).T + b2
    assert jnp.allclose(y, y_emu, atol=1e-3, rtol=1e-3)

    print("KERNEL_OK")
</pallas_src>

<mosaic_0001>
module attributes {stable_mosaic.version = 11 : i64} {
  func.func @_two_layer_kernel(%arg0: i32, %arg1: memref<16x128xf32, #tpu.memory_space<vmem>>, %arg2: memref<128x128xbf16, #tpu.memory_space<vmem>>, %arg3: memref<1x128xf32, #tpu.memory_space<vmem>>, %arg4: memref<128x128xbf16, #tpu.memory_space<vmem>>, %arg5: memref<1x128xf32, #tpu.memory_space<vmem>>, %arg6: memref<16x128xf32, #tpu.memory_space<vmem>>) attributes {dimension_semantics = [#tpu.dimension_semantics<parallel>], iteration_bounds = array<i64: 1>, scalar_prefetch = 0 : i64, scratch_operands = 0 : i64, tpu.core_type = #tpu.core_type<tc>, window_params = [{transform_indices = @transform_0, window_bounds = array<i64: 16, 128>}, {pipeline_mode = #tpu.pipeline_mode<synchronous>, transform_indices = @transform_1, window_bounds = array<i64: 128, 128>}, {pipeline_mode = #tpu.pipeline_mode<synchronous>, transform_indices = @transform_2, window_bounds = array<i64: 1, 128>}, {pipeline_mode = #tpu.pipeline_mode<synchronous>, transform_indices = @transform_3, window_bounds = array<i64: 128, 128>}, {pipeline_mode = #tpu.pipeline_mode<synchronous>, transform_indices = @transform_4, window_bounds = array<i64: 1, 128>}, {transform_indices = @transform_5, window_bounds = array<i64: 16, 128>}]} {
    %c0 = arith.constant 0 : index
    %c0_0 = arith.constant 0 : index
    %0 = vector.load %arg1[%c0, %c0_0] : memref<16x128xf32, #tpu.memory_space<vmem>>, vector<16x128xf32>
    %1 = arith.truncf %0 : vector<16x128xf32> to vector<16x128xbf16>
    %c0_1 = arith.constant 0 : index
    %c0_2 = arith.constant 0 : index
    %2 = vector.load %arg2[%c0_1, %c0_2] : memref<128x128xbf16, #tpu.memory_space<vmem>>, vector<128x128xbf16>
    %cst = arith.constant dense<0.000000e+00> : vector<16x128xf32>
    %3 = tpu.matmul %1, %2, %cst {dimension_numbers = #tpu.dot_dimension_numbers<[1], [0], [0], [1], [0, 0, 1, 1], [], []>} : vector<16x128xbf16>, vector<128x128xbf16>, vector<16x128xf32> -> vector<16x128xf32>
    %c0_3 = arith.constant 0 : index
    %c0_4 = arith.constant 0 : index
    %4 = vector.load %arg3[%c0_3, %c0_4] : memref<1x128xf32, #tpu.memory_space<vmem>>, vector<1x128xf32>
    %5 = vector.broadcast %4 : vector<1x128xf32> to vector<16x128xf32>
    %6 = arith.addf %3, %5 : vector<16x128xf32>
    %cst_5 = arith.constant 0.000000e+00 : f32
    %7 = vector.broadcast %cst_5 : f32 to vector<16x128xf32>
    %8 = arith.maximumf %6, %7 : vector<16x128xf32>
    %9 = arith.truncf %8 : vector<16x128xf32> to vector<16x128xbf16>
    %c0_6 = arith.constant 0 : index
    %c0_7 = arith.constant 0 : index
    %10 = vector.load %arg4[%c0_6, %c0_7] : memref<128x128xbf16, #tpu.memory_space<vmem>>, vector<128x128xbf16>
    %cst_8 = arith.constant dense<0.000000e+00> : vector<16x128xf32>
    %11 = tpu.matmul %9, %10, %cst_8 {dimension_numbers = #tpu.dot_dimension_numbers<[1], [0], [0], [1], [0, 0, 1, 1], [], []>} : vector<16x128xbf16>, vector<128x128xbf16>, vector<16x128xf32> -> vector<16x128xf32>
    %c0_9 = arith.constant 0 : index
    %c0_10 = arith.constant 0 : index
    %12 = vector.load %arg5[%c0_9, %c0_10] : memref<1x128xf32, #tpu.memory_space<vmem>>, vector<1x128xf32>
    %13 = vector.broadcast %12 : vector<1x128xf32> to vector<16x128xf32>
    %14 = arith.addf %11, %13 : vector<16x128xf32>
    %c0_11 = arith.constant 0 : index
    %c0_12 = arith.constant 0 : index
    %15 = vector.load %arg6[%c0_11, %c0_12] : memref<16x128xf32, #tpu.memory_space<vmem>>, vector<16x128xf32>
    tpu.vector_store %arg6[%c0_11, %c0_12], %14 {strides = array<i32>} : memref<16x128xf32, #tpu.memory_space<vmem>>, vector<16x128xf32>,
    return
  }
  func.func @transform_0(%arg0: i32) -> (i32, i32) {
    %c0_i32 = arith.constant 0 : i32
    %c0_i32_0 = arith.constant 0 : i32
    return %arg0, %c0_i32 : i32, i32
  }
  func.func @transform_1(%arg0: i32) -> (i32, i32) {
    %c0_i32 = arith.constant 0 : i32
    %c0_i32_0 = arith.constant 0 : i32
    %c0_i32_1 = arith.constant 0 : i32
    return %c0_i32, %c0_i32_0 : i32, i32
  }
  func.func @transform_2(%arg0: i32) -> (i32, i32) {
    %c0_i32 = arith.constant 0 : i32
    %c0_i32_0 = arith.constant 0 : i32
    %c0_i32_1 = arith.constant 0 : i32
    return %c0_i32, %c0_i32_0 : i32, i32
  }
  func.func @transform_3(%arg0: i32) -> (i32, i32) {
    %c0_i32 = arith.constant 0 : i32
    %c0_i32_0 = arith.constant 0 : i32
    %c0_i32_1 = arith.constant 0 : i32
    return %c0_i32, %c0_i32_0 : i32, i32
  }
  func.func @transform_4(%arg0: i32) -> (i32, i32) {
    %c0_i32 = arith.constant 0 : i32
    %c0_i32_0 = arith.constant 0 : i32
    %c0_i32_1 = arith.constant 0 : i32
    return %c0_i32, %c0_i32_0 : i32, i32
  }
  func.func @transform_5(%arg0: i32) -> (i32, i32) {
    %c0_i32 = arith.constant 0 : i32
    %c0_i32_0 = arith.constant 0 : i32
    return %arg0, %c0_i32 : i32, i32
  }
}

</mosaic_0001>

<bundles_post_ra>
// kernel: two_layer_net.1
= control target key start
LH: loop header
LB: loop body
LE: loop exit
PB: predicated region body
PF: predicated region fallthrough
CT: control target
= control target key end

     0   :  { %v351_v0 = vmov 0.0   ;;  %vm352_vm0 = vmmov 0   ;;  %s449_s1 = inlined_call_operand.vmem [shape: bf16[128,128], index: 1, kind: input, shape index: {}]   ;;  %s450_s3 = inlined_call_operand.vmem [shape: bf16[128,128], index: 3, kind: input, shape index: {}]   ;;  %s451_s0 = inlined_call_operand.vmem [shape: f32[16,128], index: 0, kind: input, shape index: {}]   ;;  %s452_s2 = inlined_call_operand.vmem [shape: f32[1,128], index: 2, kind: input, shape index: {}]   ;;  %s453_s4 = inlined_call_operand.vmem [shape: f32[1,128], index: 4, kind: input, shape index: {}]   ;;  %s454_s5 = inlined_call_operand.vmem [shape: f32[16,128], index: 5, kind: output, shape index: {}]  }
   0x1   :  { %293 = vmatprep.subr.bf16.mxu0 %v351_v0  ;;  %v335_v1 = vld [vmem:[%s449_s1] sm:$0xff]   ;;  %309 = vmatprep.mubr.msk.bf16.mxu0 %vm352_vm0, %v351_v0  ;;  %v336_v2 = vld [vmem:[%s449_s1 + $0x8] sm:$0xff]   ;;  %v337_v3 = vld [vmem:[%s449_s1 + $0x10] sm:$0xff]  }
   0x2   :  { %313 = vmatprep.subr.bf16.mxu1 %v351_v0  ;;  %329 = vmatprep.mubr.msk.bf16.mxu1 %vm352_vm0, %v351_v0  ;;  %v343_v4 = vld [vmem:[%s450_s3] sm:$0xff]   ;;  %v338_v5 = vld [vmem:[%s449_s1 + $0x18] sm:$0xff]   ;;  %v344_v6 = vld [vmem:[%s450_s3 + $0x8] sm:$0xff]  }
   0x3   :  { %294 = vmatpush3.bf16.msra.mxu0 %v335_v1  ;;  %314 = vmatpush3.bf16.msra.mxu1 %v343_v4  ;;  %v339_v7 = vld [vmem:[%s449_s1 + $0x20] sm:$0xff]   ;;  %v345_v8 = vld [vmem:[%s450_s3 + $0x10] sm:$0xff]   ;;  %v340_v9 = vld [vmem:[%s449_s1 + $0x28] sm:$0xff]  }
   0x4   :  { %295 = vmatprep.subr.bf16.mxu0 %v351_v0  ;;  %315 = vmatprep.subr.bf16.mxu1 %v351_v0  ;;  %v346_v10 = vld [vmem:[%s450_s3 + $0x18] sm:$0xff]   ;;  %v341_v11 = vld [vmem:[%s449_s1 + $0x30] sm:$0xff]   ;;  %v347_v12 = vld [vmem:[%s450_s3 + $0x20] sm:$0xff]  }
   0x5   :  { %v342_v13 = vld [vmem:[%s449_s1 + $0x38] sm:$0xff]   ;;  %v21_v14 = vld [vmem:[%s451_s0] sm:$0xff]  ;;  %v22_v15 = vld [vmem:[%s451_s0 + $0x8] sm:$0xff] }
   0x6   :  { %v348_v16 = vld [vmem:[%s450_s3 + $0x28] sm:$0xff]   ;;  %v23_v17 = vpack.c.bf16 %v22_v15, %v21_v14  ;;  %v349_v18 = vld [vmem:[%s450_s3 + $0x30] sm:$0xff]   ;;  %v350_v19 = vld [vmem:[%s450_s3 + $0x38] sm:$0xff]  }
   0x7   :  { %296 = vmatpush3.bf16.msra.mxu0 %v336_v2  ;;  %316 = vmatpush3.bf16.msra.mxu1 %v344_v6  ;;  %v257_v20 = vld [vmem:[%s452_s2] ss:$0 sm:$0xff] }
   0x8   :  { %297 = vmatprep.subr.bf16.mxu0 %v351_v0  ;;  %317 = vmatprep.subr.bf16.mxu1 %v351_v0  ;;  %v266_v30 = vld [vmem:[%s453_s4] ss:$0 sm:$0xff] }
   0xb   :  { %298 = vmatpush3.bf16.msra.mxu0 %v337_v3  ;;  %318 = vmatpush3.bf16.msra.mxu1 %v345_v8 }
   0xc   :  { %299 = vmatprep.subr.bf16.mxu0 %v351_v0  ;;  %319 = vmatprep.subr.bf16.mxu1 %v351_v0 }
   0xf   :  { %300 = vmatpush3.bf16.msra.mxu0 %v338_v5  ;;  %320 = vmatpush3.bf16.msra.mxu1 %v346_v10 }
  0x10   :  { %301 = vmatprep.subr.bf16.mxu0 %v351_v0  ;;  %321 = vmatprep.subr.bf16.mxu1 %v351_v0 }
  0x13   :  { %302 = vmatpush3.bf16.msra.mxu0 %v339_v7  ;;  %322 = vmatpush3.bf16.msra.mxu1 %v347_v12 }
  0x14   :  { %303 = vmatprep.subr.bf16.mxu0 %v351_v0  ;;  %323 = vmatprep.subr.bf16.mxu1 %v351_v0 }
  0x17   :  { %304 = vmatpush3.bf16.msra.mxu0 %v340_v9  ;;  %324 = vmatpush3.bf16.msra.mxu1 %v348_v16 }
  0x18   :  { %305 = vmatprep.subr.bf16.mxu0 %v351_v0  ;;  %325 = vmatprep.subr.bf16.mxu1 %v351_v0 }
  0x1b   :  { %306 = vmatpush3.bf16.msra.mxu0 %v341_v11  ;;  %326 = vmatpush3.bf16.msra.mxu1 %v349_v18 }
  0x1c   :  { %307 = vmatprep.subr.bf16.mxu0 %v351_v0  ;;  %327 = vmatprep.subr.bf16.mxu1 %v351_v0 }
  0x1f   :  { %308 = vmatpush3.bf16.msra.mxu0 %v342_v13  ;;  %328 = vmatpush3.bf16.msra.mxu1 %v350_v19 }
  0x22   :  { %310 = vmatmul.mubr.bf16.vlgmr.msra.gmra.mrb[0].mxu0 %v23_v17 }
  0xf5   :  { %v129_v21 = vpop.f32.mrb[0].mxu0 }
  0xf6   :  { %v130_v22 = vadd.f32 %v257_v20, %v129_v21  ;;  %v311_v23 = vpop.f32.mrb[1].mxu0 }
  0xf7   :  { %v132_v24 = vpop.f32.mrb[2].mxu0 }
  0xf8   :  { %v133_v25 = vadd.f32 %v257_v20, %v132_v24  ;;  %v312_v26 = vpop.f32.mrb[3].mxu0  ;;  %v136_v27 = vmax.f32 %v130_v22, 0.0 }
  0xfa   :  { %v137_v28 = vmax.f32 %v133_v25, 0.0 }
  0xfc   :  { %v138_v29 = vpack.c.bf16 %v137_v28, %v136_v27 }
  0xfe   :  { %330 = vmatmul.mubr.bf16.vlgmr.msra.gmra.mrb[0].mxu1 %v138_v29 }
 0x1d1   :  { %v244_v31 = vpop.f32.mrb[0].mxu1 }
 0x1d2   :  { %v245_v32 = vadd.f32 %v266_v30, %v244_v31  ;;  %v331_v33 = vpop.f32.mrb[1].mxu1 }
 0x1d3   :  { %v247_v34 = vpop.f32.mrb[2].mxu1 }
 0x1d4   :  { %251 = vst [vmem:[%s454_s5] sm:$0xff] %v245_v32  ;;  %v248_v35 = vadd.f32 %v266_v30, %v247_v34  ;;  %v332_v36 = vpop.f32.mrb[3].mxu1 }
 0x1d6   :  { %252 = vst [vmem:[%s454_s5 + $0x8] sm:$0xff] %v248_v35 }

</bundles_post_ra>
